<compile_context>
chip_gen: v7x
topology: tpu7x:2x2x1
jax: 0.10.0
libtpu: 0.0.40
codegen_flags: <defaults>
</compile_context>

<pallas_src>
import functools

import jax
import jax.numpy as jnp
from jax.experimental import pallas as pl
from jax.experimental.pallas import tpu as pltpu


# ----------------------------------------------------------------------------
# Pallas kernel: fused [Linear -> tanh] * (L-1) -> Linear
# ----------------------------------------------------------------------------
def _make_kernel(n_layers):
    def kernel(*refs):
        x_ref, o_ref = refs[0], refs[-1]
        p_refs = refs[1:-1]                               # (w1, b1, w2, b2, ...)
        # In-kernel cast of x (f32 in HBM -> compute dtype on the VPU).
        h = x_ref[...].astype(p_refs[0].dtype)
        for li in range(n_layers):
            w_ref, b_ref = p_refs[2 * li], p_refs[2 * li + 1]
            h = jnp.dot(h.astype(w_ref.dtype), w_ref[...],
                        preferred_element_type=jnp.float32) + b_ref[...]
            if li < n_layers - 1:
                h = jnp.tanh(h)                           # f32 bias-add + tanh
        o_ref[...] = h.astype(o_ref.dtype)
    return kernel


# ----------------------------------------------------------------------------
# Helpers
# ----------------------------------------------------------------------------
def _round_up(n, m):
    return ((n + m - 1) // m) * m


def _cdiv(a, b):
    return -(-a // b)


def _pad2d(a, rows, cols):
    return jnp.pad(a, ((0, rows - a.shape[0]), (0, cols - a.shape[1])))


def prepare_params(params, in_dim, compute_dtype=jnp.bfloat16):
    """One-time pad (to 128-lane multiples) + cast of the FCNet parameters.

    Weights are stored (in_dim, out_dim) and cast to the MXU compute dtype;
    biases stay f32 (added to the f32 accumulator).  Padded rows/cols are zero
    so nothing leaks through tanh into later layers.
    """
    dims = (in_dim,) + tuple(w.shape[1] for (w, _) in params)
    pdims = tuple(_round_up(d, 128) for d in dims)
    flat = []
    for li, (w, b) in enumerate(params):
        w_p = _pad2d(jnp.asarray(w), pdims[li], pdims[li + 1]).astype(compute_dtype)
        b_p = _pad2d(jnp.asarray(b).reshape(1, -1), 1, pdims[li + 1]).astype(jnp.float32)
        flat += [w_p, b_p]
    return tuple(flat), dims, pdims


# ----------------------------------------------------------------------------
# Jitted forward: flatten, balanced batch tiling, fused MLP kernel, slice back.
# ----------------------------------------------------------------------------
@functools.partial(jax.jit, static_argnames=("dims", "pdims", "tm", "out_dtype"))
def _encoder_forward(x, flat_params, dims, pdims, tm, out_dtype):
    n_layers = len(flat_params) // 2
    n_batch = x.shape[0]
    x_flat = x.reshape(n_batch, -1)                       # glue: flatten in JAX
    in_dim = x_flat.shape[1]
    assert in_dim == dims[0], "input feature size does not match prepared params"

    # --- balanced batch tiling -------------------------------------------------
    sub_in = 8 * (4 // jnp.dtype(x_flat.dtype).itemsize)   # 8 for f32, 16 for bf16
    sub_out = 8 * (4 // jnp.dtype(out_dtype).itemsize)
    sublane = max(sub_in, sub_out)

    n_tiles = max(1, _cdiv(n_batch, tm))
    tm_eff = _round_up(_cdiv(n_batch, n_tiles), sublane)
    m_pad = _round_up(n_batch, tm_eff)
    # Ensure >= 2 grid steps when the batch allows it so both v7x TensorCores
    # get work (dimension_semantics=("parallel",)); ~free on v5e/v6e.
    if m_pad // tm_eff == 1 and n_batch > sublane:
        tm_eff = _round_up(_cdiv(n_batch, 2), sublane)
        m_pad = _round_up(n_batch, tm_eff)
    grid = (m_pad // tm_eff,)

    # Only pad x when actually needed; no cast here (kernel casts on the VPU).
    if m_pad != n_batch or pdims[0] != in_dim:
        x_in = jnp.pad(x_flat, ((0, m_pad - n_batch), (0, pdims[0] - in_dim)))
    else:
        x_in = x_flat

    # --- BlockSpecs --------------------------------------------------------------
    x_spec = pl.BlockSpec((tm_eff, pdims[0]), lambda i: (i, 0))
    out_spec = pl.BlockSpec((tm_eff, pdims[-1]), lambda i: (i, 0))
    resident = lambda a: pl.BlockSpec(a.shape, lambda i: (0, 0))   # VMEM-resident

    flops = 2 * m_pad * sum(pdims[i] * pdims[i + 1] for i in range(n_layers))
    transcendentals = m_pad * sum(pdims[1:-1])
    bytes_accessed = (x_in.size * x_in.dtype.itemsize
                      + sum(p.size * p.dtype.itemsize for p in flat_params)
                      + m_pad * pdims[-1] * jnp.dtype(out_dtype).itemsize)

    out = pl.pallas_call(
        _make_kernel(n_layers),
        out_shape=jax.ShapeDtypeStruct((m_pad, pdims[-1]), out_dtype),
        grid=grid,
        in_specs=[x_spec] + [resident(p) for p in flat_params],
        out_specs=out_spec,
        compiler_params=pltpu.CompilerParams(
            dimension_semantics=("parallel",)),
        cost_estimate=pl.CostEstimate(flops=flops,
                                      transcendentals=transcendentals,
                                      bytes_accessed=bytes_accessed),
    )(x_in, *flat_params)

    # Slice off batch and lane padding.
    # TODO(synk): for latency-critical consumers, fuse this slice into the consumer
    # (or request out_dtype=bfloat16) instead of a separate XLA copy.
    return out[:n_batch, :dims[-1]]


def encoder_fcnet_forward(x, prepared, *, tm=512, out_dtype=None):
    """x: (n_batch, my*mx, in_size) -> beta: (n_batch, n_latent)."""
    flat_params, dims, pdims = prepared
    if out_dtype is None:
        out_dtype = x.dtype
    if x.shape[0] == 0:                                    # guard degenerate batch
        return jnp.zeros((0, dims[-1]), out_dtype)
    return _encoder_forward(x, flat_params, dims=dims, pdims=pdims,
                            tm=int(tm), out_dtype=jnp.dtype(out_dtype))


# ----------------------------------------------------------------------------
# Deterministic parameter init (PyTorch-Linear-style uniform bounds).
# Weights stored as (in_dim, out_dim) (transpose of torch.nn.Linear.weight).
# ----------------------------------------------------------------------------
def init_params(key, layers_list, dtype=jnp.float32):
    params = []
    for i in range(len(layers_list) - 1):
        fan_in, fan_out = layers_list[i], layers_list[i + 1]
        key, kw, kb = jax.random.split(key, 3)
        bound = 1.0 / (fan_in ** 0.5)
        w = jax.random.uniform(kw, (fan_in, fan_out), dtype,
                               minval=-bound, maxval=bound)
        b = jax.random.uniform(kb, (1, fan_out), dtype,
                               minval=-bound, maxval=bound)
        params.append((w, b))
    return params


def reference_forward(x, params):
    """Pure-JAX (f32) reference of EncoderFCNet.forward."""
    h = x.reshape(x.shape[0], -1)
    n_layers = len(params)
    for i, (w, b) in enumerate(params):
        h = h @ w + b
        if i < n_layers - 1:
            h = jnp.tanh(h)
    return h


if __name__ == "__main__":
    # x: (n_batch, my*mx, in_size) = (2, 64, 4)  ->  in_dim = 256
    spatial, in_size = 64, 4
    layers_list = [spatial * in_size, 128, 64, 32]        # n_latent = 32

    key = jax.random.PRNGKey(0)
    key, kx_small, kx_big = jax.random.split(key, 3)
    params = init_params(key, layers_list, jnp.float32)

    # Pad/cast parameters ONCE per compute dtype (outside the per-call path).
    prep_f32 = prepare_params(params, layers_list[0], compute_dtype=jnp.float32)
    prep_bf16 = prepare_params(params, layers_list[0], compute_dtype=jnp.bfloat16)

    # --- Case 1: tiny batch (spec shape), f32 compute path, tight tolerance ---
    x_small = jax.random.normal(kx_small, (2, spatial, in_size), jnp.float32)
    beta_f32 = jax.block_until_ready(encoder_fcnet_forward(x_small, prep_f32))
    ref_small = reference_forward(x_small, params)
    assert beta_f32.shape == (2, layers_list[-1])
    assert jnp.allclose(beta_f32, ref_small, atol=1e-5, rtol=1e-5), \
        "f32 kernel mismatch vs reference"

    # --- Case 2: larger batch exercising the grid (2 balanced tiles of 192), ---
    # --- bf16 MXU operands with f32 accumulation, x cast in-kernel.           ---
    x_big = jax.random.normal(kx_big, (384, spatial, in_size), jnp.float32)
    beta_bf16 = jax.block_until_ready(encoder_fcnet_forward(x_big, prep_bf16))
    ref_big = reference_forward(x_big, params)
    assert beta_bf16.shape == (384, layers_list[-1])
    assert jnp.allclose(beta_bf16, ref_big, atol=5e-2, rtol=5e-2), \
        "bf16 kernel mismatch vs reference"

    print("KERNEL_OK")
</pallas_src>

<mosaic_0001>
module attributes {stable_mosaic.version = 11 : i64} {
  func.func @kernel(%arg0: i32, %arg1: memref<8x256xf32, #tpu.memory_space<vmem>>, %arg2: memref<256x128xf32, #tpu.memory_space<vmem>>, %arg3: memref<1x128xf32, #tpu.memory_space<vmem>>, %arg4: memref<128x128xf32, #tpu.memory_space<vmem>>, %arg5: memref<1x128xf32, #tpu.memory_space<vmem>>, %arg6: memref<128x128xf32, #tpu.memory_space<vmem>>, %arg7: memref<1x128xf32, #tpu.memory_space<vmem>>, %arg8: memref<8x128xf32, #tpu.memory_space<vmem>>) attributes {dimension_semantics = [#tpu.dimension_semantics<parallel>], iteration_bounds = array<i64: 1>, scalar_prefetch = 0 : i64, scratch_operands = 0 : i64, tpu.core_type = #tpu.core_type<tc>, window_params = [{transform_indices = @transform_0, window_bounds = array<i64: 8, 256>}, {pipeline_mode = #tpu.pipeline_mode<synchronous>, transform_indices = @transform_1, window_bounds = array<i64: 256, 128>}, {pipeline_mode = #tpu.pipeline_mode<synchronous>, transform_indices = @transform_2, window_bounds = array<i64: 1, 128>}, {pipeline_mode = #tpu.pipeline_mode<synchronous>, transform_indices = @transform_3, window_bounds = array<i64: 128, 128>}, {pipeline_mode = #tpu.pipeline_mode<synchronous>, transform_indices = @transform_4, window_bounds = array<i64: 1, 128>}, {pipeline_mode = #tpu.pipeline_mode<synchronous>, transform_indices = @transform_5, window_bounds = array<i64: 128, 128>}, {pipeline_mode = #tpu.pipeline_mode<synchronous>, transform_indices = @transform_6, window_bounds = array<i64: 1, 128>}, {transform_indices = @transform_7, window_bounds = array<i64: 8, 128>}]} {
    %c0 = arith.constant 0 : index
    %c0_0 = arith.constant 0 : index
    %0 = vector.load %arg1[%c0, %c0_0] : memref<8x256xf32, #tpu.memory_space<vmem>>, vector<8x256xf32>
    %c0_1 = arith.constant 0 : index
    %c0_2 = arith.constant 0 : index
    %1 = vector.load %arg2[%c0_1, %c0_2] : memref<256x128xf32, #tpu.memory_space<vmem>>, vector<256x128xf32>
    %cst = arith.constant dense<0.000000e+00> : vector<8x128xf32>
    %2 = tpu.matmul %0, %1, %cst {dimension_numbers = #tpu.dot_dimension_numbers<[1], [0], [0], [1], [0, 0, 1, 1], [], []>} : vector<8x256xf32>, vector<256x128xf32>, vector<8x128xf32> -> vector<8x128xf32>
    %c0_3 = arith.constant 0 : index
    %c0_4 = arith.constant 0 : index
    %3 = vector.load %arg3[%c0_3, %c0_4] : memref<1x128xf32, #tpu.memory_space<vmem>>, vector<1x128xf32>
    %4 = vector.broadcast %3 : vector<1x128xf32> to vector<8x128xf32>
    %5 = arith.addf %2, %4 : vector<8x128xf32>
    %6 = math.tanh %5 : vector<8x128xf32>
    %c0_5 = arith.constant 0 : index
    %c0_6 = arith.constant 0 : index
    %7 = vector.load %arg4[%c0_5, %c0_6] : memref<128x128xf32, #tpu.memory_space<vmem>>, vector<128x128xf32>
    %cst_7 = arith.constant dense<0.000000e+00> : vector<8x128xf32>
    %8 = tpu.matmul %6, %7, %cst_7 {dimension_numbers = #tpu.dot_dimension_numbers<[1], [0], [0], [1], [0, 0, 1, 1], [], []>} : vector<8x128xf32>, vector<128x128xf32>, vector<8x128xf32> -> vector<8x128xf32>
    %c0_8 = arith.constant 0 : index
    %c0_9 = arith.constant 0 : index
    %9 = vector.load %arg5[%c0_8, %c0_9] : memref<1x128xf32, #tpu.memory_space<vmem>>, vector<1x128xf32>
    %10 = vector.broadcast %9 : vector<1x128xf32> to vector<8x128xf32>
    %11 = arith.addf %8, %10 : vector<8x128xf32>
    %12 = math.tanh %11 : vector<8x128xf32>
    %c0_10 = arith.constant 0 : index
    %c0_11 = arith.constant 0 : index
    %13 = vector.load %arg6[%c0_10, %c0_11] : memref<128x128xf32, #tpu.memory_space<vmem>>, vector<128x128xf32>
    %cst_12 = arith.constant dense<0.000000e+00> : vector<8x128xf32>
    %14 = tpu.matmul %12, %13, %cst_12 {dimension_numbers = #tpu.dot_dimension_numbers<[1], [0], [0], [1], [0, 0, 1, 1], [], []>} : vector<8x128xf32>, vector<128x128xf32>, vector<8x128xf32> -> vector<8x128xf32>
    %c0_13 = arith.constant 0 : index
    %c0_14 = arith.constant 0 : index
    %15 = vector.load %arg7[%c0_13, %c0_14] : memref<1x128xf32, #tpu.memory_space<vmem>>, vector<1x128xf32>
    %16 = vector.broadcast %15 : vector<1x128xf32> to vector<8x128xf32>
    %17 = arith.addf %14, %16 : vector<8x128xf32>
    %c0_15 = arith.constant 0 : index
    %c0_16 = arith.constant 0 : index
    %18 = vector.load %arg8[%c0_15, %c0_16] : memref<8x128xf32, #tpu.memory_space<vmem>>, vector<8x128xf32>
    tpu.vector_store %arg8[%c0_15, %c0_16], %17 {strides = array<i32>} : memref<8x128xf32, #tpu.memory_space<vmem>>, vector<8x128xf32>,
    return
  }
  func.func @transform_0(%arg0: i32) -> (i32, i32) {
    %c0_i32 = arith.constant 0 : i32
    %c0_i32_0 = arith.constant 0 : i32
    return %arg0, %c0_i32 : i32, i32
  }
  func.func @transform_1(%arg0: i32) -> (i32, i32) {
    %c0_i32 = arith.constant 0 : i32
    %c0_i32_0 = arith.constant 0 : i32
    %c0_i32_1 = arith.constant 0 : i32
    return %c0_i32, %c0_i32_0 : i32, i32
  }
  func.func @transform_2(%arg0: i32) -> (i32, i32) {
    %c0_i32 = arith.constant 0 : i32
    %c0_i32_0 = arith.constant 0 : i32
    %c0_i32_1 = arith.constant 0 : i32
    return %c0_i32, %c0_i32_0 : i32, i32
  }
  func.func @transform_3(%arg0: i32) -> (i32, i32) {
    %c0_i32 = arith.constant 0 : i32
    %c0_i32_0 = arith.constant 0 : i32
    %c0_i32_1 = arith.constant 0 : i32
    return %c0_i32, %c0_i32_0 : i32, i32
  }
  func.func @transform_4(%arg0: i32) -> (i32, i32) {
    %c0_i32 = arith.constant 0 : i32
    %c0_i32_0 = arith.constant 0 : i32
    %c0_i32_1 = arith.constant 0 : i32
    return %c0_i32, %c0_i32_0 : i32, i32
  }
  func.func @transform_5(%arg0: i32) -> (i32, i32) {
    %c0_i32 = arith.constant 0 : i32
    %c0_i32_0 = arith.constant 0 : i32
    %c0_i32_1 = arith.constant 0 : i32
    return %c0_i32, %c0_i32_0 : i32, i32
  }
  func.func @transform_6(%arg0: i32) -> (i32, i32) {
    %c0_i32 = arith.constant 0 : i32
    %c0_i32_0 = arith.constant 0 : i32
    %c0_i32_1 = arith.constant 0 : i32
    return %c0_i32, %c0_i32_0 : i32, i32
  }
  func.func @transform_7(%arg0: i32) -> (i32, i32) {
    %c0_i32 = arith.constant 0 : i32
    %c0_i32_0 = arith.constant 0 : i32
    return %arg0, %c0_i32 : i32, i32
  }
}

</mosaic_0001>

<bundles_post_ra>
// kernel: _encoder_forward.1
= control target key start
LH: loop header
LB: loop body
LE: loop exit
PB: predicated region body
PF: predicated region fallthrough
CT: control target
= control target key end

     0   :  { %12 = vsyncpa [#allocation3], 0  ;;  %s842_s0 = inlined_call_operand.vmem [shape: f32[8,256], index: 0, kind: input, shape index: {}]   ;;  %s843_s1 = inlined_call_operand.vmem [shape: f32[256,128], index: 1, kind: input, shape index: {}]   ;;  %s844_s2 = inlined_call_operand.vmem [shape: f32[1,128], index: 2, kind: input, shape index: {}]   ;;  %s845_s3 = inlined_call_operand.hbm [shape: f32[128,128], index: 3, kind: input, shape index: {}]   ;;  %s846_s4 = inlined_call_operand.vmem [shape: f32[1,128], index: 4, kind: input, shape index: {}]   ;;  %s847_s5 = inlined_call_operand.hbm [shape: f32[128,128], index: 5, kind: input, shape index: {}]   ;;  %s848_s6 = inlined_call_operand.vmem [shape: f32[1,128], index: 6, kind: input, shape index: {}]   ;;  %s849_s7 = inlined_call_operand.vmem [shape: f32[8,128], index: 7, kind: output, shape index: {}]  }
   0x1   :  { %13 = vsyncpa [#allocation5], 0  ;;  %s641_s24 = smov [#allocation2]   ;;  %s593_s28 = scalar_lea.hbm %s845_s3, 2048 }
   0x2   :  { %s25_s25 = sshll.u32 %s641_s24, 4  ;;  %p594_p0 = scmp.ne.s32.totalorder %s845_s3, %s593_s28  ;;  %s26_s25 = int_to_ptr.vmem [resolvable:$true] %s25_s25 }
   0x3   :  { %p597_p1 = scmp.lt.u32.totalorder %s593_s28, %s845_s3 }
   0x5   :  { %p599_p2 = pnand %p597_p1, %p594_p0 }
   0x7   :  { %602 = shalt.err (!%p599_p2)
}
   0x8   :  { %s603_s10 = scalar_lea.vmem %s26_s25, 2048  ;;  %p608_p4 = scmp.lt.s32.totalorder %s26_s25, %s26_s25 }
   0x9   :  { %p604_p3 = scmp.ne.s32.totalorder %s26_s25, %s603_s10  ;;  %p609_p5 = scmp.lt.s32.totalorder %s603_s10, %s603_s10 }
   0xb   :  { %p610_p6 = por %p609_p5, %p608_p4 }
   0xd   :  { %p611_p7 = pnand %p610_p6, %p604_p3 }
   0xf   :  { %614 = shalt.err (!%p611_p7)
}
  0x10   :  { %s642_s11 = smov 128   ;;  %s643_s12 = smov 8  }
  0x11   :  { %31 = dma.hbm_to_vmem [thread:$0]  %s845_s3, 2048, %s26_s25, [#allocation3], %s642_s11, %s642_s11, %s643_s12  }
  0x12   :  { %s644_s15 = smov [#allocation4]   ;;  %s615_s19 = scalar_lea.hbm %s847_s5, 2048 }
  0x13   :  { %s39_s16 = sshll.u32 %s644_s15, 4  ;;  %p616_p8 = scmp.ne.s32.totalorder %s847_s5, %s615_s19  ;;  %s40_s16 = int_to_ptr.vmem [resolvable:$true] %s39_s16 }
  0x14   :  { %p619_p9 = scmp.lt.u32.totalorder %s615_s19, %s847_s5 }
  0x16   :  { %p621_p10 = pnand %p619_p9, %p616_p8 }
  0x18   :  { %624 = shalt.err (!%p621_p10)
}
  0x19   :  { %s625_s24 = scalar_lea.vmem %s40_s16, 2048  ;;  %p630_p12 = scmp.lt.s32.totalorder %s40_s16, %s40_s16 }
  0x1a   :  { %p626_p11 = scmp.ne.s32.totalorder %s40_s16, %s625_s24  ;;  %p631_p13 = scmp.lt.s32.totalorder %s625_s24, %s625_s24 }
  0x1c   :  { %p632_p0 = por %p631_p13, %p630_p12 }
  0x1e   :  { %p633_p1 = pnand %p632_p0, %p626_p11 }
  0x20   :  { %636 = shalt.err (!%p633_p1)
}
  0x21   :  { %45 = dma.hbm_to_vmem [thread:$0]  %s847_s5, 2048, %s40_s16, [#allocation5], %s642_s11, %s642_s11, %s643_s12  }
  0x22   :  { %637 = dma.done.wait [#allocation3], 2048  }
  0x23   :  { %638 = vsyncadd [#allocation3], 4294965248 }
  0x24   :  { %639 = dma.done.wait [#allocation5], 2048  }
  0x25   :  { %640 = vsyncadd [#allocation5], 4294965248  ;;  %v645_v0 = vmov 0.0|0.0   ;;  %v72_v1 = vld [vmem:[%s843_s1 + $0x80] sm:$0xff]  ;;  %v73_v2 = vld [vmem:[%s843_s1 + $0x88] sm:$0xff]  ;;  %vm646_vm0 = vmmov 0  }
  0x26   :  { %534 = vmatprep.subr.bf16.mxu1 %v645_v0  ;;  %v56_v3 = vld [vmem:[%s843_s1] sm:$0xff]  ;;  %v502_v4 = vpack.c.bf16 %v73_v2, %v72_v1  ;;  %v57_v5 = vld [vmem:[%s843_s1 + $0x8] sm:$0xff]  ;;  %v74_v6 = vld [vmem:[%s843_s1 + $0x90] sm:$0xff] }
  0x27   :  { %v75_v7 = vld [vmem:[%s843_s1 + $0x98] sm:$0xff]  ;;  %v504_v8 = vpack.c.bf16 %v57_v5, %v56_v3  ;;  %v58_v10 = vld [vmem:[%s843_s1 + $0x10] sm:$0xff]  ;;  %v76_v12 = vld [vmem:[%s843_s1 + $0xa0] sm:$0xff] }
  0x28   :  { %v506_v9 = vpack.c.bf16 %v75_v7, %v74_v6  ;;  %v59_v11 = vld [vmem:[%s843_s1 + $0x18] sm:$0xff]  ;;  %503 = vmatprep.subr.bf16.mxu0 %v502_v4  ;;  %v77_v13 = vld [vmem:[%s843_s1 + $0xa8] sm:$0xff]  ;;  %v60_v16 = vld [vmem:[%s843_s1 + $0x20] sm:$0xff] }
  0x29   :  { %505 = vmatpush3.bf16.msra.mxu0 %v504_v8  ;;  %v508_v14 = vpack.c.bf16 %v59_v11, %v58_v10  ;;  %v510_v15 = vpack.c.bf16 %v77_v13, %v76_v12  ;;  %v61_v17 = vld [vmem:[%s843_s1 + $0x28] sm:$0xff]  ;;  %v78_v18 = vld [vmem:[%s843_s1 + $0xb0] sm:$0xff]  ;;  %v79_v19 = vld [vmem:[%s843_s1 + $0xb8] sm:$0xff]  ;;  %v647_v11 = vmov 0.0  }
  0x2a   :  { %507 = vmatprep.subr.bf16.mxu0 %v506_v9  ;;  %v512_v20 = vpack.c.bf16 %v61_v17, %v60_v16  ;;  %v514_v21 = vpack.c.bf16 %v79_v19, %v78_v18  ;;  %v62_v22 = vld [vmem:[%s843_s1 + $0x30] sm:$0xff]  ;;  %v63_v23 = vld [vmem:[%s843_s1 + $0x38] sm:$0xff]  ;;  %v80_v24 = vld [vmem:[%s843_s1 + $0xc0] sm:$0xff]  ;;  %464 = vmatprep.mubr.msk.f32.mxu1 %vm646_vm0, %v647_v11 }
  0x2b   :  { %v81_v25 = vld [vmem:[%s843_s1 + $0xc8] sm:$0xff]  ;;  %v166_v27 = vld [vmem:[#allocation2] sm:$0xff]  ;;  %v516_v29 = vpack.c.bf16 %v63_v23, %v62_v22  ;;  %v168_v31 = vld [vmem:[#allocation2 + $0x10] sm:$0xff] }
  0x2c   :  { %v55_v26 = vld [vmem:[%s842_s0 + $0x8] sm:$0xff]  ;;  %v169_v32 = vld [vmem:[#allocation2 + $0x18] sm:$0xff]  ;;  %v518_v33 = vpack.c.bf16 %v81_v25, %v80_v24  ;;  %v64_v34 = vld [vmem:[%s843_s1 + $0x40] sm:$0xff] }
  0x2d   :  { %509 = vmatpush3.bf16.msra.mxu0 %v508_v14  ;;  %159 = vmatprep.mubr.f32.mxu0 %v55_v26  ;;  %v167_v28 = vld [vmem:[#allocation2 + $0x8] sm:$0xff]  ;;  %v82_v36 = vld [vmem:[%s843_s1 + $0xd0] sm:$0xff]  ;;  %v83_v37 = vld [vmem:[%s843_s1 + $0xd8] sm:$0xff]  ;;  %v538_v38 = vpack.c.bf16 %v169_v32, %v168_v31 }
  0x2e   :  { %511 = vmatprep.subr.bf16.mxu0 %v510_v15  ;;  %v535_v30 = vpack.c.bf16 %v167_v28, %v166_v27  ;;  %v65_v35 = vld [vmem:[%s843_s1 + $0x48] sm:$0xff]  ;;  %v170_v39 = vld [vmem:[#allocation2 + $0x20] sm:$0xff]  ;;  %v522_v42 = vpack.c.bf16 %v83_v37, %v82_v36  ;;  %v66_v43 = vld [vmem:[%s843_s1 + $0x50] sm:$0xff] }
  0x2f   :  { %v171_v40 = vld [vmem:[#allocation2 + $0x28] sm:$0xff]  ;;  %v520_v41 = vpack.c.bf16 %v65_v35, %v64_v34  ;;  %v67_v44 = vld [vmem:[%s843_s1 + $0x58] sm:$0xff]  ;;  %v84_v45 = vld [vmem:[%s843_s1 + $0xe0] sm:$0xff] }
  0x30   :  { %536 = vmatpush3.bf16.msra.mxu1 %v535_v30  ;;  %v85_v46 = vld [vmem:[%s843_s1 + $0xe8] sm:$0xff]  ;;  %v541_v47 = vpack.c.bf16 %v171_v40, %v170_v39  ;;  %v172_v48 = vld [vmem:[#allocation2 + $0x30] sm:$0xff]  ;;  %v173_v49 = vld [vmem:[#allocation2 + $0x38] sm:$0xff]  ;;  %v524_v50 = vpack.c.bf16 %v67_v44, %v66_v43 }
  0x31   :  { %513 = vmatpush3.bf16.msra.mxu0 %v512_v20  ;;  %537 = vmatprep.subr.bf16.mxu1 %v645_v0  ;;  %v526_v51 = vpack.c.bf16 %v85_v46, %v84_v45  ;;  %v68_v52 = vld [vmem:[%s843_s1 + $0x60] sm:$0xff]  ;;  %v69_v53 = vld [vmem:[%s843_s1 + $0x68] sm:$0xff]  ;;  %v86_v54 = vld [vmem:[%s843_s1 + $0xf0] sm:$0xff]  ;;  %v544_v56 = vpack.c.bf16 %v173_v49, %v172_v48 }
  0x32   :  { %515 = vmatprep.subr.bf16.mxu0 %v514_v21  ;;  %v87_v55 = vld [vmem:[%s843_s1 + $0xf8] sm:$0xff]  ;;  %v528_v57 = vpack.c.bf16 %v69_v53, %v68_v52  ;;  %v70_v59 = vld [vmem:[%s843_s1 + $0x70] sm:$0xff]  ;;  %v54_v62 = vld [vmem:[%s842_s0] sm:$0xff] }
  0x33   :  { %v530_v58 = vpack.c.bf16 %v87_v55, %v86_v54  ;;  %v71_v60 = vld [vmem:[%s843_s1 + $0x78] sm:$0xff]  ;;  %v174_v63 = vld [vmem:[#allocation2 + $0x40] sm:$0xff]  ;;  %v175_v1 = vld [vmem:[#allocation2 + $0x48] sm:$0xff] }
  0x34   :  { %539 = vmatpush3.bf16.msra.mxu1 %v538_v38  ;;  %v532_v61 = vpack.c.bf16 %v71_v60, %v70_v59  ;;  %v547_v2 = vpack.c.bf16 %v175_v1, %v174_v63  ;;  %v176_v3 = vld [vmem:[#allocation2 + $0x50] sm:$0xff]  ;;  %v177_v4 = vld [vmem:[#allocation2 + $0x58] sm:$0xff]  ;;  %v178_v6 = vld [vmem:[#allocation2 + $0x60] sm:$0xff] }
  0x35   :  { %517 = vmatpush3.bf16.msra.mxu0 %v516_v29  ;;  %540 = vmatprep.subr.bf16.mxu1 %v645_v0  ;;  %v550_v5 = vpack.c.bf16 %v177_v4, %v176_v3  ;;  %v179_v7 = vld [vmem:[#allocation2 + $0x68] sm:$0xff]  ;;  %v180_v9 = vld [vmem:[#allocation2 + $0x70] sm:$0xff]  ;;  %v181_v10 = vld [vmem:[#allocation2 + $0x78] sm:$0xff] }
  0x36   :  { %519 = vmatprep.subr.bf16.mxu0 %v518_v33  ;;  %v553_v8 = vpack.c.bf16 %v179_v7, %v178_v6  ;;  %v556_v12 = vpack.c.bf16 %v181_v10, %v180_v9  ;;  %v260_v13 = vld [vmem:[#allocation4] sm:$0xff]  ;;  %v261_v14 = vld [vmem:[#allocation4 + $0x8] sm:$0xff]  ;;  %v262_v15 = vld [vmem:[#allocation4 + $0x10] sm:$0xff] }
  0x37   :  { %v559_v16 = vpack.c.bf16 %v261_v14, %v260_v13  ;;  %v263_v17 = vld [vmem:[#allocation4 + $0x18] sm:$0xff]  ;;  %v264_v19 = vld [vmem:[#allocation4 + $0x20] sm:$0xff]  ;;  %v265_v20 = vld [vmem:[#allocation4 + $0x28] sm:$0xff] }
  0x38   :  { %542 = vmatpush3.bf16.msra.mxu1 %v541_v47  ;;  %v562_v18 = vpack.c.bf16 %v263_v17, %v262_v15  ;;  %v565_v21 = vpack.c.bf16 %v265_v20, %v264_v19  ;;  %v266_v22 = vld [vmem:[#allocation4 + $0x30] sm:$0xff]  ;;  %v267_v23 = vld [vmem:[#allocation4 + $0x38] sm:$0xff]  ;;  %v268_v25 = vld [vmem:[#allocation4 + $0x40] sm:$0xff] }
  0x39   :  { %521 = vmatpush3.bf16.msra.mxu0 %v520_v41  ;;  %543 = vmatprep.subr.bf16.mxu1 %v645_v0  ;;  %v568_v24 = vpack.c.bf16 %v267_v23, %v266_v22  ;;  %v269_v26 = vld [vmem:[#allocation4 + $0x48] sm:$0xff]  ;;  %v360_v29 = vld [vmem:[%s844_s2] ss:$0 sm:$0xff]  ;;  %v270_v34 = vld [vmem:[#allocation4 + $0x50] sm:$0xff] }
  0x3a   :  { %523 = vmatprep.subr.bf16.mxu0 %v522_v42  ;;  %v571_v27 = vpack.c.bf16 %v269_v26, %v268_v25  ;;  %v271_v35 = vld [vmem:[#allocation4 + $0x58] sm:$0xff]  ;;  %v272_v37 = vld [vmem:[#allocation4 + $0x60] sm:$0xff]  ;;  %v273_v38 = vld [vmem:[#allocation4 + $0x68] sm:$0xff] }
  0x3b   :  { %v574_v36 = vpack.c.bf16 %v271_v35, %v270_v34  ;;  %v577_v39 = vpack.c.bf16 %v273_v38, %v272_v37  ;;  %v274_v40 = vld [vmem:[#allocation4 + $0x70] sm:$0xff]  ;;  %v275_v41 = vld [vmem:[#allocation4 + $0x78] sm:$0xff]  ;;  %v361_v43 = vld [vmem:[%s846_s4] ss:$0 sm:$0xff] }
  0x3c   :  { %545 = vmatpush3.bf16.msra.mxu1 %v544_v56  ;;  %v580_v42 = vpack.c.bf16 %v275_v41, %v274_v40  ;;  %v362_v48 = vld [vmem:[%s848_s6] ss:$0 sm:$0xff] }
  0x3d   :  { %525 = vmatpush3.bf16.msra.mxu0 %v524_v50  ;;  %546 = vmatprep.subr.bf16.mxu1 %v645_v0 }
  0x3e   :  { %527 = vmatprep.subr.bf16.mxu0 %v526_v51 }
  0x40   :  { %548 = vmatpush3.bf16.msra.mxu1 %v547_v2 }
  0x41   :  { %529 = vmatpush3.bf16.msra.mxu0 %v528_v57  ;;  %549 = vmatprep.subr.bf16.mxu1 %v645_v0 }
  0x42   :  { %531 = vmatprep.subr.bf16.mxu0 %v530_v58 }
  0x44   :  { %551 = vmatpush3.bf16.msra.mxu1 %v550_v5 }
  0x45   :  { %533 = vmatpush3.bf16.msra.mxu0 %v532_v61  ;;  %552 = vmatprep.subr.bf16.mxu1 %v645_v0 }
  0x46   :  { %558 = vmatprep.subr.bf16.mxu0 %v645_v0 }
  0x48   :  { %160 = vmatmul.mubr.f32.vlgmr.msra.gmra.mrb[0].mxu0 %v54_v62  ;;  %554 = vmatpush3.bf16.msra.mxu1 %v553_v8 }
  0x49   :  { %499 = vmatprep.mubr.msk.f32.mxu0 %vm646_vm0, %v647_v11  ;;  %555 = vmatprep.subr.bf16.mxu1 %v645_v0 }
  0x4a   :  { %560 = vmatpush3.bf16.msra.mxu0 %v559_v16 }
  0x4b   :  { %561 = vmatprep.subr.bf16.mxu0 %v645_v0 }
  0x4c   :  { %557 = vmatpush3.bf16.msra.mxu1 %v556_v12 }
  0x4e   :  { %563 = vmatpush3.bf16.msra.mxu0 %v562_v18 }
  0x4f   :  { %564 = vmatprep.subr.bf16.mxu0 %v645_v0 }
  0x52   :  { %566 = vmatpush3.bf16.msra.mxu0 %v565_v21 }
  0x53   :  { %567 = vmatprep.subr.bf16.mxu0 %v645_v0 }
  0x56   :  { %569 = vmatpush3.bf16.msra.mxu0 %v568_v24 }
  0x57   :  { %570 = vmatprep.subr.bf16.mxu0 %v645_v0 }
  0x5a   :  { %572 = vmatpush3.bf16.msra.mxu0 %v571_v27 }
  0x5b   :  { %573 = vmatprep.subr.bf16.mxu0 %v645_v0 }
  0x5e   :  { %575 = vmatpush3.bf16.msra.mxu0 %v574_v36 }
  0x5f   :  { %576 = vmatprep.subr.bf16.mxu0 %v645_v0 }
  0x62   :  { %578 = vmatpush3.bf16.msra.mxu0 %v577_v39 }
  0x63   :  { %579 = vmatprep.subr.bf16.mxu0 %v645_v0 }
  0x66   :  { %581 = vmatpush3.bf16.msra.mxu0 %v580_v42 }
 0x11b   :  { %v395_v28 = vpop.f32.mrb[0].mxu0 }
 0x11c   :  { %v396_v30 = vpop.f32.mrb[1].mxu0 }
 0x11d   :  { %v397_v31 = vadd.f32 %v396_v30, %v395_v28 }
 0x11f   :  { %v162_v32 = vadd.f32 %v397_v31, %v360_v29 }
 0x121   :  { %589 = vtanh.f32 %v162_v32 }
 0x12b   :  { %v590_v33 = vpop.eup %589 }
 0x12c   :  { %465 = vmatmul.mubr.f32.vlgmr.msra.gmra.mrb[0].mxu1 %v590_v33 }
 0x1ff   :  { %v255_v44 = vpop.f32.mrb[0].mxu1 }
 0x200   :  { %v256_v45 = vadd.f32 %v361_v43, %v255_v44  ;;  %v466_v46 = vpop.f32.mrb[1].mxu1 }
 0x202   :  { %591 = vtanh.f32 %v256_v45 }
 0x20c   :  { %v592_v47 = vpop.eup %591 }
 0x20d   :  { %500 = vmatmul.mubr.f32.vlgmr.msra.gmra.mrb[2].mxu0 %v592_v47 }
 0x2e0   :  { %v349_v49 = vpop.f32.mrb[2].mxu0 }
 0x2e1   :  { %v350_v50 = vadd.f32 %v362_v48, %v349_v49  ;;  %v501_v51 = vpop.f32.mrb[3].mxu0 }
 0x2e3   :  { %353 = vst [vmem:[%s849_s7] sm:$0xff] %v350_v50 }
 0x2e4   :  { %358 = vsyncpa [#allocation3], 1 }
 0x2e5   :  { %359 = vsyncpa [#allocation5], 1 }

</bundles_post_ra>
